<compile_context>
chip_gen: v7x
topology: tpu7x:2x2x1
jax: 0.10.0
libtpu: 0.0.40
codegen_flags: <defaults>
</compile_context>

<pallas_src>
import math

import jax
import jax.numpy as jnp
from jax.experimental import pallas as pl
from jax.experimental.pallas import tpu as pltpu


def _round_up(x, m):
    return ((x + m - 1) // m) * m


def _largest_divisor_tile(total, candidates):
    for c in candidates:
        if total % c == 0:
            return c
    return total


def _rnn_cell_kernel(xh_ref, w_ref, b_ref, out_ref):
    """out = tanh(xh @ W + b): single MXU pass, f32 accumulate, f32 epilogue."""
    acc = jnp.dot(xh_ref[...], w_ref[...], preferred_element_type=jnp.float32)
    out_ref[...] = jnp.tanh(acc + b_ref[...]).astype(out_ref.dtype)


def pack_rnn_cell_params(w_ih, w_hh, b_ih, b_hh, *, compute_dtype=jnp.bfloat16):
    """Fuse + pre-transpose + pad RNNCell weights ONCE (call at model init).

    Returns a dict with:
      w : (K_pad, N_pad) compute_dtype -- [[W_ih^T], [W_hh^T]] zero-padded
      b : (1,  N_pad)    float32       -- (b_ih + b_hh) zero-padded
    plus shape metadata used by rnn_cell_forward.
    """
    hidden_size, input_size = w_ih.shape
    K = input_size + hidden_size
    K_pad = _round_up(K, 128)
    N_pad = _round_up(hidden_size, 128)

    w = jnp.concatenate([w_ih.T, w_hh.T], axis=0).astype(compute_dtype)  # (K, H)
    b = (b_ih + b_hh).astype(jnp.float32).reshape(1, hidden_size)        # (1, H)

    w_p = jnp.zeros((K_pad, N_pad), compute_dtype).at[:K, :hidden_size].set(w)
    b_p = jnp.zeros((1, N_pad), jnp.float32).at[:, :hidden_size].set(b)

    return dict(
        w=w_p, b=b_p,
        input_size=input_size, hidden_size=hidden_size,
        K=K, K_pad=K_pad, N_pad=N_pad,
        compute_dtype=compute_dtype,
    )


def rnn_cell_forward(x, h, packed):
    """One tanh-RNNCell step using pre-packed (fused/padded) weights."""
    batch = x.shape[0]
    input_size = packed["input_size"]
    hidden_size = packed["hidden_size"]
    K = packed["K"]
    K_pad = packed["K_pad"]
    N_pad = packed["N_pad"]
    compute_dtype = packed["compute_dtype"]
    out_dtype = x.dtype
    bytes_per = jnp.dtype(compute_dtype).itemsize

    # ---- Fused, padded activation slab [x, h]  (only per-call prep left).
    M_pad = _round_up(batch, 16)  # 16 = bf16 sublane packing
    xh_p = jnp.zeros((M_pad, K_pad), compute_dtype)
    xh_p = xh_p.at[:batch, :input_size].set(x.astype(compute_dtype))
    xh_p = xh_p.at[:batch, input_size:K].set(h.astype(compute_dtype))

    # ---- Tile selection: no K-tiling; big lane-dense N tiles.
    tm = _largest_divisor_tile(M_pad, (256, 128, 64, 32, 16))
    if N_pad <= 1024:
        tn = N_pad
    else:
        tn = _largest_divisor_tile(N_pad, (1024, 512, 256, 128))
    # Keep double-buffered (K_pad, tn) weight tile <= ~16 MiB (v7x budget).
    while tn > 128 and 2 * K_pad * tn * bytes_per > 16 * 1024 * 1024:
        tn //= 2
    # v7x has 2 TensorCores: avoid a 1x1 parallel grid when N can be split.
    if M_pad // tm == 1 and N_pad // tn == 1 and N_pad % 256 == 0:
        tn = N_pad // 2

    grid = (M_pad // tm, N_pad // tn)

    # Rough VMEM budget (double-buffered tiles) -> compiler hint.
    vmem_bytes = 2 * (tm * K_pad * bytes_per     # xh tile
                      + K_pad * tn * bytes_per   # W tile
                      + tn * 4                   # bias tile
                      + tm * tn * 4)             # out tile (f32)
    vmem_limit = min(128 * 1024 * 1024, max(vmem_bytes + (4 << 20), 32 << 20))

    cost = pl.CostEstimate(
        flops=2 * M_pad * K_pad * N_pad,
        transcendentals=M_pad * N_pad,
        bytes_accessed=(M_pad * K_pad * bytes_per + K_pad * N_pad * bytes_per
                        + N_pad * 4 + M_pad * N_pad * 4),
    )

    out_p = pl.pallas_call(
        _rnn_cell_kernel,
        out_shape=jax.ShapeDtypeStruct((M_pad, N_pad), out_dtype),
        grid_spec=pltpu.PrefetchScalarGridSpec(
            num_scalar_prefetch=0,
            grid=grid,
            in_specs=[
                pl.BlockSpec((tm, K_pad), lambda i, j: (i, 0)),   # fused [x, h]
                pl.BlockSpec((K_pad, tn), lambda i, j: (0, j)),   # fused W
                pl.BlockSpec((1, tn), lambda i, j: (0, j)),       # fused bias
            ],
            out_specs=pl.BlockSpec((tm, tn), lambda i, j: (i, j)),
        ),
        compiler_params=pltpu.CompilerParams(
            dimension_semantics=("parallel", "parallel"),
            vmem_limit_bytes=vmem_limit,
        ),
        cost_estimate=cost,
    )(xh_p, packed["w"], packed["b"])

    return out_p[:batch, :hidden_size]


class Model:
    """JAX/Pallas mirror of the PyTorch Model (a single nn.RNNCell)."""

    def __init__(self, input_size, hidden_size, batch_size, key,
                 compute_dtype=jnp.bfloat16):
        self.batch_size = batch_size
        self.input_size = input_size
        self.hidden_size = hidden_size

        # Deterministic init mimicking PyTorch RNNCell: U(-1/sqrt(H), 1/sqrt(H))
        bound = 1.0 / math.sqrt(hidden_size)
        k1, k2, k3, k4 = jax.random.split(key, 4)
        self.w_ih = jax.random.uniform(
            k1, (hidden_size, input_size), jnp.float32, -bound, bound)
        self.w_hh = jax.random.uniform(
            k2, (hidden_size, hidden_size), jnp.float32, -bound, bound)
        self.b_ih = jax.random.uniform(
            k3, (hidden_size,), jnp.float32, -bound, bound)
        self.b_hh = jax.random.uniform(
            k4, (hidden_size,), jnp.float32, -bound, bound)

        # Fuse/transpose/pad the weights ONCE at init (not per forward call).
        self.packed = pack_rnn_cell_params(
            self.w_ih, self.w_hh, self.b_ih, self.b_hh,
            compute_dtype=compute_dtype)
        jax.block_until_ready(self.packed["w"])

    def forward(self, x, hidden):
        return rnn_cell_forward(x, hidden, self.packed)

    def init_hidden(self):
        return jnp.zeros((self.batch_size, self.hidden_size), jnp.float32)


if __name__ == "__main__":
    batch_size = 1
    hidden_size = 4
    input_size = 4

    key = jax.random.PRNGKey(0)
    k_model, k_x = jax.random.split(key)

    model = Model(input_size, hidden_size, batch_size, k_model)

    x = jax.random.normal(k_x, (batch_size, input_size), jnp.float32)
    h0 = model.init_hidden()

    # Pure-JAX f32 reference.
    ref = jnp.tanh(x @ model.w_ih.T + model.b_ih + h0 @ model.w_hh.T + model.b_hh)

    # Default path: pre-packed bf16 MXU inputs, f32 accumulation + epilogue.
    h1 = model.forward(x, h0)
    jax.block_until_ready(h1)
    assert h1.shape == (batch_size, hidden_size)
    assert jnp.allclose(h1, ref, atol=2e-2, rtol=2e-2)

    # f32 compute path: tight check of the kernel plumbing (padding/tiling/fusion).
    packed_f32 = pack_rnn_cell_params(
        model.w_ih, model.w_hh, model.b_ih, model.b_hh,
        compute_dtype=jnp.float32)
    h1_f32 = rnn_cell_forward(x, h0, packed_f32)
    jax.block_until_ready(h1_f32)
    assert jnp.allclose(h1_f32, ref, atol=1e-5, rtol=1e-5)

    print("KERNEL_OK")
</pallas_src>

<mosaic_0001>
module attributes {stable_mosaic.version = 11 : i64} {
  func.func @_rnn_cell_kernel(%arg0: i32, %arg1: i32, %arg2: memref<16x128xbf16, #tpu.memory_space<vmem>>, %arg3: memref<128x128xbf16, #tpu.memory_space<vmem>>, %arg4: memref<1x128xf32, #tpu.memory_space<vmem>>, %arg5: memref<16x128xf32, #tpu.memory_space<vmem>>) attributes {dimension_semantics = [#tpu.dimension_semantics<parallel>, #tpu.dimension_semantics<parallel>], iteration_bounds = array<i64: 1, 1>, scalar_prefetch = 0 : i64, scratch_operands = 0 : i64, tpu.core_type = #tpu.core_type<tc>, window_params = [{transform_indices = @transform_0, window_bounds = array<i64: 16, 128>}, {transform_indices = @transform_1, window_bounds = array<i64: 128, 128>}, {transform_indices = @transform_2, window_bounds = array<i64: 1, 128>}, {transform_indices = @transform_3, window_bounds = array<i64: 16, 128>}]} {
    %c0 = arith.constant 0 : index
    %c0_0 = arith.constant 0 : index
    %0 = vector.load %arg2[%c0, %c0_0] : memref<16x128xbf16, #tpu.memory_space<vmem>>, vector<16x128xbf16>
    %c0_1 = arith.constant 0 : index
    %c0_2 = arith.constant 0 : index
    %1 = vector.load %arg3[%c0_1, %c0_2] : memref<128x128xbf16, #tpu.memory_space<vmem>>, vector<128x128xbf16>
    %cst = arith.constant dense<0.000000e+00> : vector<16x128xf32>
    %2 = tpu.matmul %0, %1, %cst {dimension_numbers = #tpu.dot_dimension_numbers<[1], [0], [0], [1], [0, 0, 1, 1], [], []>} : vector<16x128xbf16>, vector<128x128xbf16>, vector<16x128xf32> -> vector<16x128xf32>
    %c0_3 = arith.constant 0 : index
    %c0_4 = arith.constant 0 : index
    %3 = vector.load %arg4[%c0_3, %c0_4] : memref<1x128xf32, #tpu.memory_space<vmem>>, vector<1x128xf32>
    %4 = vector.broadcast %3 : vector<1x128xf32> to vector<16x128xf32>
    %5 = arith.addf %2, %4 : vector<16x128xf32>
    %6 = math.tanh %5 : vector<16x128xf32>
    %c0_5 = arith.constant 0 : index
    %c0_6 = arith.constant 0 : index
    %7 = vector.load %arg5[%c0_5, %c0_6] : memref<16x128xf32, #tpu.memory_space<vmem>>, vector<16x128xf32>
    tpu.vector_store %arg5[%c0_5, %c0_6], %6 {strides = array<i32>} : memref<16x128xf32, #tpu.memory_space<vmem>>, vector<16x128xf32>,
    return
  }
  func.func @transform_0(%arg0: i32, %arg1: i32) -> (i32, i32) {
    %c0_i32 = arith.constant 0 : i32
    %c0_i32_0 = arith.constant 0 : i32
    return %arg0, %c0_i32 : i32, i32
  }
  func.func @transform_1(%arg0: i32, %arg1: i32) -> (i32, i32) {
    %c0_i32 = arith.constant 0 : i32
    %c0_i32_0 = arith.constant 0 : i32
    return %c0_i32, %arg1 : i32, i32
  }
  func.func @transform_2(%arg0: i32, %arg1: i32) -> (i32, i32) {
    %c0_i32 = arith.constant 0 : i32
    %c0_i32_0 = arith.constant 0 : i32
    return %c0_i32, %arg1 : i32, i32
  }
  func.func @transform_3(%arg0: i32, %arg1: i32) -> (i32, i32) {
    %c0_i32 = arith.constant 0 : i32
    return %arg0, %arg1 : i32, i32
  }
}

</mosaic_0001>

<bundles_post_ra>
// kernel: tpu_custom_call.1
= control target key start
LH: loop header
LB: loop body
LE: loop exit
PB: predicated region body
PF: predicated region fallthrough
CT: control target
= control target key end

     0   :  { %8 = vsyncpa [#allocation3], 0  ;;  %s387_s0 = inlined_call_operand.hbm [shape: bf16[16,128], index: 0, kind: input, shape index: {}]   ;;  %s388_s1 = inlined_call_operand.hbm [shape: bf16[128,128], index: 1, kind: input, shape index: {}]   ;;  %s389_s2 = inlined_call_operand.vmem [shape: f32[1,128], index: 2, kind: input, shape index: {}]   ;;  %s390_s3 = inlined_call_operand.hbm [shape: f32[16,128], index: 3, kind: output, shape index: {}]  }
   0x1   :  { %9 = vsyncpa [#allocation6], 0 }
   0x2   :  { %10 = vsyncpa [#allocation4], 0  ;;  %s319_s12 = smov [#allocation2]   ;;  %s247_s16 = scalar_lea.hbm %s387_s0, 128 }
   0x3   :  { %s16_s13 = sshll.u32 %s319_s12, 4  ;;  %p248_p0 = scmp.ne.s32.totalorder %s387_s0, %s247_s16  ;;  %s17_s13 = int_to_ptr.vmem [resolvable:$true] %s16_s13 }
   0x4   :  { %p251_p1 = scmp.lt.u32.totalorder %s247_s16, %s387_s0 }
   0x6   :  { %p253_p2 = pnand %p251_p1, %p248_p0 }
   0x8   :  { %256 = shalt.err (!%p253_p2)
}
   0x9   :  { %s257_s21 = scalar_lea.vmem %s17_s13, 128  ;;  %p262_p4 = scmp.lt.s32.totalorder %s17_s13, %s17_s13 }
   0xa   :  { %p258_p3 = scmp.ne.s32.totalorder %s17_s13, %s257_s21  ;;  %p263_p5 = scmp.lt.s32.totalorder %s257_s21, %s257_s21 }
   0xc   :  { %p264_p6 = por %p263_p5, %p262_p4 }
   0xe   :  { %p265_p7 = pnand %p264_p6, %p258_p3 }
  0x10   :  { %268 = shalt.err (!%p265_p7)
}
  0x11   :  { %s320_s22 = smov 64   ;;  %s321_s23 = smov 4  }
  0x12   :  { %22 = dma.hbm_to_vmem [thread:$0]  %s387_s0, 128, %s17_s13, [#allocation3], %s320_s22, %s320_s22, %s321_s23  }
  0x13   :  { %s322_s26 = smov [#allocation5]   ;;  %s269_s30 = scalar_lea.hbm %s388_s1, 1024 }
  0x14   :  { %s28_s27 = sshll.u32 %s322_s26, 4  ;;  %p270_p8 = scmp.ne.s32.totalorder %s388_s1, %s269_s30  ;;  %s29_s27 = int_to_ptr.vmem [resolvable:$true] %s28_s27 }
  0x15   :  { %p273_p9 = scmp.lt.u32.totalorder %s269_s30, %s388_s1 }
  0x17   :  { %p275_p10 = pnand %p273_p9, %p270_p8 }
  0x19   :  { %278 = shalt.err (!%p275_p10)
}
  0x1a   :  { %s279_s8 = scalar_lea.vmem %s29_s27, 1024  ;;  %p284_p12 = scmp.lt.s32.totalorder %s29_s27, %s29_s27 }
  0x1b   :  { %p280_p11 = scmp.ne.s32.totalorder %s29_s27, %s279_s8  ;;  %p285_p13 = scmp.lt.s32.totalorder %s279_s8, %s279_s8 }
  0x1d   :  { %p286_p0 = por %p285_p13, %p284_p12 }
  0x1f   :  { %p287_p1 = pnand %p286_p0, %p280_p11 }
  0x21   :  { %290 = shalt.err (!%p287_p1)
}
  0x22   :  { %34 = dma.hbm_to_vmem [thread:$0]  %s388_s1, 1024, %s29_s27, [#allocation6], %s320_s22, %s320_s22, %s321_s23  }
  0x23   :  { %313 = dma.done.wait [#allocation3], 128  }
  0x24   :  { %314 = vsyncadd [#allocation3], 4294967168 }
  0x25   :  { %315 = dma.done.wait [#allocation6], 1024  }
  0x26   :  { %316 = vsyncadd [#allocation6], 4294966272  ;;  %v323_v0 = vmov 0.0   ;;  %vm324_vm0 = vmmov 0   ;;  %v234_v1 = vld [vmem:[#allocation5] sm:$0xff]   ;;  %v235_v2 = vld [vmem:[#allocation5 + $0x8] sm:$0xff]  }
  0x27   :  { %205 = vmatprep.subr.bf16.mxu0 %v323_v0  ;;  %221 = vmatprep.mubr.msk.bf16.mxu0 %vm324_vm0, %v323_v0  ;;  %v236_v3 = vld [vmem:[#allocation5 + $0x10] sm:$0xff]   ;;  %v237_v4 = vld [vmem:[#allocation5 + $0x18] sm:$0xff]   ;;  %v238_v5 = vld [vmem:[#allocation5 + $0x20] sm:$0xff]   ;;  %s325_s11 = smov [#allocation7]  }
  0x28   :  { %206 = vmatpush3.bf16.msra.mxu0 %v234_v1  ;;  %v239_v6 = vld [vmem:[#allocation5 + $0x28] sm:$0xff]   ;;  %v240_v7 = vld [vmem:[#allocation5 + $0x30] sm:$0xff]   ;;  %v241_v8 = vld [vmem:[#allocation5 + $0x38] sm:$0xff]   ;;  %s173_s12 = sshll.u32 %s325_s11, 4  ;;  %s174_s12 = int_to_ptr.vmem [resolvable:$true] %s173_s12 }
  0x29   :  { %207 = vmatprep.subr.bf16.mxu0 %v323_v0  ;;  %v242_v9 = vld [vmem:[#allocation2] sm:$0xff]   ;;  %s291_s13 = scalar_lea.vmem %s174_s12, 256  ;;  %p296_p3 = scmp.lt.s32.totalorder %s174_s12, %s174_s12 }
  0x2a   :  { %v186_v10 = vld [vmem:[%s389_s2] ss:$0 sm:$0xff]  ;;  %p292_p2 = scmp.ne.s32.totalorder %s174_s12, %s291_s13  ;;  %p297_p4 = scmp.lt.s32.totalorder %s291_s13, %s291_s13 }
  0x2c   :  { %208 = vmatpush3.bf16.msra.mxu0 %v235_v2  ;;  %p298_p5 = por %p297_p4, %p296_p3 }
  0x2d   :  { %209 = vmatprep.subr.bf16.mxu0 %v323_v0 }
  0x2e   :  { %p299_p6 = pnand %p298_p5, %p292_p2 }
  0x30   :  { %210 = vmatpush3.bf16.msra.mxu0 %v236_v3 }
  0x31   :  { %211 = vmatprep.subr.bf16.mxu0 %v323_v0 }
  0x34   :  { %212 = vmatpush3.bf16.msra.mxu0 %v237_v4 }
  0x35   :  { %213 = vmatprep.subr.bf16.mxu0 %v323_v0 }
  0x38   :  { %214 = vmatpush3.bf16.msra.mxu0 %v238_v5 }
  0x39   :  { %215 = vmatprep.subr.bf16.mxu0 %v323_v0 }
  0x3c   :  { %216 = vmatpush3.bf16.msra.mxu0 %v239_v6 }
  0x3d   :  { %217 = vmatprep.subr.bf16.mxu0 %v323_v0 }
  0x40   :  { %218 = vmatpush3.bf16.msra.mxu0 %v240_v7 }
  0x41   :  { %219 = vmatprep.subr.bf16.mxu0 %v323_v0 }
  0x44   :  { %220 = vmatpush3.bf16.msra.mxu0 %v241_v8 }
  0x47   :  { %222 = vmatmul.mubr.bf16.vlgmr.msra.gmra.mrb[0].mxu0 %v242_v9 }
 0x11a   :  { %v157_v11 = vpop.f32.mrb[0].mxu0 }
 0x11b   :  { %v158_v12 = vadd.f32 %v186_v10, %v157_v11  ;;  %v223_v13 = vpop.f32.mrb[1].mxu0 }
 0x11c   :  { %v160_v14 = vpop.f32.mrb[2].mxu0 }
 0x11d   :  { %243 = vtanh.f32 %v158_v12  ;;  %v161_v15 = vadd.f32 %v186_v10, %v160_v14  ;;  %v224_v16 = vpop.f32.mrb[3].mxu0 }
 0x11f   :  { %245 = vtanh.f32 %v161_v15 }
 0x127   :  { %v244_v17 = vpop.eup %243 }
 0x128   :  { %166 = vst [vmem:[#allocation7] sm:$0xff] %v244_v17 }
 0x129   :  { %v246_v18 = vpop.eup %245 }
 0x12a   :  { %167 = vst [vmem:[#allocation7 + $0x8] sm:$0xff] %v246_v18 }
 0x12b   :  { %302 = shalt.err (!%p299_p6)
}
 0x12c   :  { %s303_s15 = scalar_lea.hbm %s390_s3, 256 }
 0x12d   :  { %p304_p7 = scmp.ne.s32.totalorder %s390_s3, %s303_s15  ;;  %p307_p8 = scmp.lt.u32.totalorder %s303_s15, %s390_s3 }
 0x12f   :  { %p309_p9 = pnand %p307_p8, %p304_p7 }
 0x131   :  { %312 = shalt.err (!%p309_p9)
}
 0x132   :  { %s326_s20 = smov 128   ;;  %s327_s21 = smov 8  }
 0x133   :  { %179 = dma.vmem_to_hbm [thread:$0]  %s174_s12, 256, %s390_s3, [#allocation4], %s326_s20, %s326_s20, %s327_s21  }
 0x134   :  { %317 = dma.done.wait [#allocation4], 256  }
 0x135   :  { %318 = vsyncadd [#allocation4], 4294967040 }
 0x136   :  { %183 = vsyncpa [#allocation3], 1 }
 0x137   :  { %184 = vsyncpa [#allocation6], 1 }
 0x138   :  { %185 = vsyncpa [#allocation4], 1 }

</bundles_post_ra>
